<compile_context>
chip_gen: v7x
topology: tpu7x:2x2x1
jax: 0.10.0
libtpu: 0.0.40
codegen_flags: <defaults>
</compile_context>

<pallas_src>
import functools

import jax
import jax.numpy as jnp
from jax.experimental import pallas as pl
from jax.experimental.pallas import tpu as pltpu


def _cdiv(a, b):
    return (a + b - 1) // b


def _round_up(n, m):
    return _cdiv(n, m) * m


def dqn_kernel(x_ref, w1_ref, b1_ref, w2_ref, b2_ref, w3_ref, b3_ref, o_ref):
    # Cast x to bf16 in-kernel (VPU, hidden under the input DMA); f32 accumulation.
    xb = x_ref[...].astype(jnp.bfloat16)
    # fc1 + ReLU
    h1 = jnp.dot(xb, w1_ref[...], preferred_element_type=jnp.float32)
    h1 = jnp.maximum(h1 + b1_ref[...], 0.0)
    # fc2 + ReLU
    h2 = jnp.dot(h1.astype(jnp.bfloat16), w2_ref[...],
                 preferred_element_type=jnp.float32)
    h2 = jnp.maximum(h2 + b2_ref[...], 0.0)
    # fc3 (Q-values, no activation); unpadded narrow output, masked vst is fine.
    out = jnp.dot(h2.astype(jnp.bfloat16), w3_ref[...],
                  preferred_element_type=jnp.float32) + b3_ref[...]
    o_ref[...] = out.astype(o_ref.dtype)


def _choose_tiling(B, cap):
    """Pick (TB, Bp): 8-aligned tile, even grid >= 2 (v7x megacore) when B is big."""
    bp8 = _round_up(B, 8)
    if bp8 <= 16:
        # Tiny batch: a single step; splitting across cores isn't worth it.
        return bp8, bp8
    ng = max(2, _cdiv(bp8, cap))
    if ng % 2:
        ng += 1                      # even grid so both v7x TCs get equal work
    tb = _round_up(_cdiv(bp8, ng), 8)
    return tb, ng * tb


@functools.partial(jax.jit, static_argnames=("tb_cap",))
def dqn_forward(x, params, *, tb_cap=2048):
    """x: [B, input_dim] float32; params: dict of w1,b1,w2,b2,w3,b3.

    Weights may be f32 (raw init) or bf16 (from prepare_params); biases f32.
    """
    w1, b1, w2, b2, w3, b3 = (params[k] for k in ("w1", "b1", "w2", "b2", "w3", "b3"))
    B, in_dim = x.shape
    hidden = w1.shape[1]
    out_dim = w3.shape[1]

    # Weights in bf16 (no-op if already prepared once outside the hot path).
    w1b = w1 if w1.dtype == jnp.bfloat16 else w1.astype(jnp.bfloat16)
    w2b = w2 if w2.dtype == jnp.bfloat16 else w2.astype(jnp.bfloat16)
    w3b = w3 if w3.dtype == jnp.bfloat16 else w3.astype(jnp.bfloat16)

    # ---- batch tiling: even grid >= 2 for v7x, TB capped, 8-row aligned ----
    TB, Bp = _choose_tiling(B, tb_cap)
    xp = x if Bp == B else jnp.pad(x, ((0, Bp - B), (0, 0)))

    grid = (Bp // TB,)

    flops = 2 * Bp * (in_dim * hidden + hidden * hidden + hidden * out_dim)
    bytes_accessed = (xp.size * 4                                  # f32 x in
                      + w1b.size * 2 + w2b.size * 2 + w3b.size * 2  # bf16 weights
                      + b1.size * 4 + b2.size * 4 + b3.size * 4     # f32 biases
                      + Bp * out_dim * 4)                           # f32 out

    # Grid-invariant weight/bias specs (index_map -> (0, 0)) keep them
    # VMEM-resident across all batch tiles; x/out tiles are pipelined.
    inv = lambda a: pl.BlockSpec(a.shape, lambda i: (0, 0))

    out = pl.pallas_call(
        dqn_kernel,
        out_shape=jax.ShapeDtypeStruct((Bp, out_dim), jnp.float32),
        grid_spec=pltpu.PrefetchScalarGridSpec(
            num_scalar_prefetch=0,
            grid=grid,
            in_specs=[
                pl.BlockSpec((TB, in_dim), lambda i: (i, 0)),   # x tile (f32)
                inv(w1b), inv(b1),
                inv(w2b), inv(b2),
                inv(w3b), inv(b3),
            ],
            out_specs=pl.BlockSpec((TB, out_dim), lambda i: (i, 0)),
        ),
        compiler_params=pltpu.CompilerParams(
            dimension_semantics=("parallel",)),
        cost_estimate=pl.CostEstimate(
            flops=flops, transcendentals=0, bytes_accessed=bytes_accessed),
    )(xp, w1b, b1, w2b, b2, w3b, b3)

    return out if Bp == B else out[:B]


def init_params(key, input_dim, output_dim, hidden=128):
    """Deterministic init mimicking nn.Linear default (uniform +-1/sqrt(fan_in))."""
    def linear(key, fan_in, fan_out):
        kw, kb = jax.random.split(key)
        bound = 1.0 / jnp.sqrt(fan_in)
        w = jax.random.uniform(kw, (fan_in, fan_out), jnp.float32, -bound, bound)
        b = jax.random.uniform(kb, (1, fan_out), jnp.float32, -bound, bound)
        return w, b

    k1, k2, k3 = jax.random.split(key, 3)
    w1, b1 = linear(k1, input_dim, hidden)
    w2, b2 = linear(k2, hidden, hidden)
    w3, b3 = linear(k3, hidden, output_dim)
    return {"w1": w1, "b1": b1, "w2": w2, "b2": b2, "w3": w3, "b3": b3}


def prepare_params(params):
    """One-time weight prep (bf16 cast) hoisted out of the per-step hot path."""
    out = dict(params)
    for k in ("w1", "w2", "w3"):
        out[k] = params[k].astype(jnp.bfloat16)
    return out


def dqn_reference_bf16(x, p):
    """Reference matching the kernel's bf16-input / f32-accumulation arithmetic."""
    xb = x.astype(jnp.bfloat16)
    h1 = jnp.maximum(
        jnp.dot(xb, p["w1"].astype(jnp.bfloat16),
                preferred_element_type=jnp.float32) + p["b1"], 0.0)
    h2 = jnp.maximum(
        jnp.dot(h1.astype(jnp.bfloat16), p["w2"].astype(jnp.bfloat16),
                preferred_element_type=jnp.float32) + p["b2"], 0.0)
    return jnp.dot(h2.astype(jnp.bfloat16), p["w3"].astype(jnp.bfloat16),
                   preferred_element_type=jnp.float32) + p["b3"]


def dqn_reference_f32(x, p):
    h1 = jnp.maximum(x @ p["w1"] + p["b1"], 0.0)
    h2 = jnp.maximum(h1 @ p["w2"] + p["b2"], 0.0)
    return h2 @ p["w3"] + p["b3"]


if __name__ == "__main__":
    key = jax.random.PRNGKey(0)
    k_params, k_x = jax.random.split(key)

    batch, input_dim, output_dim = 2, 32, 8
    params = init_params(k_params, input_dim, output_dim)
    prepped = prepare_params(params)   # one-time bf16 weight cast (hot-path hoist)
    x = jax.random.normal(k_x, (batch, input_dim), jnp.float32)

    out = jax.block_until_ready(dqn_forward(x, prepped))

    ref_bf16 = dqn_reference_bf16(x, params)
    ref_f32 = dqn_reference_f32(x, params)

    assert out.shape == (batch, output_dim)
    # Exact-arithmetic match against the bf16-matched reference.
    assert jnp.allclose(out, ref_bf16, atol=1e-4, rtol=1e-4)
    # Loose match against the pure-f32 reference (bf16 rounding of inputs/weights).
    assert jnp.allclose(out, ref_f32, atol=3e-2, rtol=3e-2)
    print("KERNEL_OK")
</pallas_src>

<mosaic_0001>
module attributes {stable_mosaic.version = 11 : i64} {
  func.func @dqn_kernel(%arg0: i32, %arg1: memref<8x32xf32, #tpu.memory_space<vmem>>, %arg2: memref<32x128xbf16, #tpu.memory_space<vmem>>, %arg3: memref<1x128xf32, #tpu.memory_space<vmem>>, %arg4: memref<128x128xbf16, #tpu.memory_space<vmem>>, %arg5: memref<1x128xf32, #tpu.memory_space<vmem>>, %arg6: memref<128x8xbf16, #tpu.memory_space<vmem>>, %arg7: memref<1x8xf32, #tpu.memory_space<vmem>>, %arg8: memref<8x8xf32, #tpu.memory_space<vmem>>) attributes {dimension_semantics = [#tpu.dimension_semantics<parallel>], iteration_bounds = array<i64: 1>, scalar_prefetch = 0 : i64, scratch_operands = 0 : i64, tpu.core_type = #tpu.core_type<tc>, window_params = [{transform_indices = @transform_0, window_bounds = array<i64: 8, 32>}, {pipeline_mode = #tpu.pipeline_mode<synchronous>, transform_indices = @transform_1, window_bounds = array<i64: 32, 128>}, {pipeline_mode = #tpu.pipeline_mode<synchronous>, transform_indices = @transform_2, window_bounds = array<i64: 1, 128>}, {pipeline_mode = #tpu.pipeline_mode<synchronous>, transform_indices = @transform_3, window_bounds = array<i64: 128, 128>}, {pipeline_mode = #tpu.pipeline_mode<synchronous>, transform_indices = @transform_4, window_bounds = array<i64: 1, 128>}, {pipeline_mode = #tpu.pipeline_mode<synchronous>, transform_indices = @transform_5, window_bounds = array<i64: 128, 8>}, {pipeline_mode = #tpu.pipeline_mode<synchronous>, transform_indices = @transform_6, window_bounds = array<i64: 1, 8>}, {transform_indices = @transform_7, window_bounds = array<i64: 8, 8>}]} {
    %c0 = arith.constant 0 : index
    %c0_0 = arith.constant 0 : index
    %0 = vector.load %arg1[%c0, %c0_0] : memref<8x32xf32, #tpu.memory_space<vmem>>, vector<8x32xf32>
    %1 = arith.truncf %0 : vector<8x32xf32> to vector<8x32xbf16>
    %c0_1 = arith.constant 0 : index
    %c0_2 = arith.constant 0 : index
    %2 = vector.load %arg2[%c0_1, %c0_2] : memref<32x128xbf16, #tpu.memory_space<vmem>>, vector<32x128xbf16>
    %cst = arith.constant dense<0.000000e+00> : vector<8x128xf32>
    %3 = tpu.matmul %1, %2, %cst {dimension_numbers = #tpu.dot_dimension_numbers<[1], [0], [0], [1], [0, 0, 1, 1], [], []>} : vector<8x32xbf16>, vector<32x128xbf16>, vector<8x128xf32> -> vector<8x128xf32>
    %c0_3 = arith.constant 0 : index
    %c0_4 = arith.constant 0 : index
    %4 = vector.load %arg3[%c0_3, %c0_4] : memref<1x128xf32, #tpu.memory_space<vmem>>, vector<1x128xf32>
    %5 = vector.broadcast %4 : vector<1x128xf32> to vector<8x128xf32>
    %6 = arith.addf %3, %5 : vector<8x128xf32>
    %cst_5 = arith.constant 0.000000e+00 : f32
    %7 = vector.broadcast %cst_5 : f32 to vector<8x128xf32>
    %8 = arith.maximumf %6, %7 : vector<8x128xf32>
    %9 = arith.truncf %8 : vector<8x128xf32> to vector<8x128xbf16>
    %c0_6 = arith.constant 0 : index
    %c0_7 = arith.constant 0 : index
    %10 = vector.load %arg4[%c0_6, %c0_7] : memref<128x128xbf16, #tpu.memory_space<vmem>>, vector<128x128xbf16>
    %cst_8 = arith.constant dense<0.000000e+00> : vector<8x128xf32>
    %11 = tpu.matmul %9, %10, %cst_8 {dimension_numbers = #tpu.dot_dimension_numbers<[1], [0], [0], [1], [0, 0, 1, 1], [], []>} : vector<8x128xbf16>, vector<128x128xbf16>, vector<8x128xf32> -> vector<8x128xf32>
    %c0_9 = arith.constant 0 : index
    %c0_10 = arith.constant 0 : index
    %12 = vector.load %arg5[%c0_9, %c0_10] : memref<1x128xf32, #tpu.memory_space<vmem>>, vector<1x128xf32>
    %13 = vector.broadcast %12 : vector<1x128xf32> to vector<8x128xf32>
    %14 = arith.addf %11, %13 : vector<8x128xf32>
    %cst_11 = arith.constant 0.000000e+00 : f32
    %15 = vector.broadcast %cst_11 : f32 to vector<8x128xf32>
    %16 = arith.maximumf %14, %15 : vector<8x128xf32>
    %17 = arith.truncf %16 : vector<8x128xf32> to vector<8x128xbf16>
    %c0_12 = arith.constant 0 : index
    %c0_13 = arith.constant 0 : index
    %18 = vector.load %arg6[%c0_12, %c0_13] : memref<128x8xbf16, #tpu.memory_space<vmem>>, vector<128x8xbf16>
    %cst_14 = arith.constant dense<0.000000e+00> : vector<8x8xf32>
    %19 = tpu.matmul %17, %18, %cst_14 {dimension_numbers = #tpu.dot_dimension_numbers<[1], [0], [0], [1], [0, 0, 1, 1], [], []>} : vector<8x128xbf16>, vector<128x8xbf16>, vector<8x8xf32> -> vector<8x8xf32>
    %c0_15 = arith.constant 0 : index
    %c0_16 = arith.constant 0 : index
    %20 = vector.load %arg7[%c0_15, %c0_16] : memref<1x8xf32, #tpu.memory_space<vmem>>, vector<1x8xf32>
    %21 = vector.broadcast %20 : vector<1x8xf32> to vector<8x8xf32>
    %22 = arith.addf %19, %21 : vector<8x8xf32>
    %c0_17 = arith.constant 0 : index
    %c0_18 = arith.constant 0 : index
    %23 = vector.load %arg8[%c0_17, %c0_18] : memref<8x8xf32, #tpu.memory_space<vmem>>, vector<8x8xf32>
    tpu.vector_store %arg8[%c0_17, %c0_18], %22 {strides = array<i32>} : memref<8x8xf32, #tpu.memory_space<vmem>>, vector<8x8xf32>,
    return
  }
  func.func @transform_0(%arg0: i32) -> (i32, i32) {
    %c0_i32 = arith.constant 0 : i32
    %c0_i32_0 = arith.constant 0 : i32
    return %arg0, %c0_i32 : i32, i32
  }
  func.func @transform_1(%arg0: i32) -> (i32, i32) {
    %c0_i32 = arith.constant 0 : i32
    %c0_i32_0 = arith.constant 0 : i32
    %c0_i32_1 = arith.constant 0 : i32
    return %c0_i32, %c0_i32_0 : i32, i32
  }
  func.func @transform_2(%arg0: i32) -> (i32, i32) {
    %c0_i32 = arith.constant 0 : i32
    %c0_i32_0 = arith.constant 0 : i32
    %c0_i32_1 = arith.constant 0 : i32
    return %c0_i32, %c0_i32_0 : i32, i32
  }
  func.func @transform_3(%arg0: i32) -> (i32, i32) {
    %c0_i32 = arith.constant 0 : i32
    %c0_i32_0 = arith.constant 0 : i32
    %c0_i32_1 = arith.constant 0 : i32
    return %c0_i32, %c0_i32_0 : i32, i32
  }
  func.func @transform_4(%arg0: i32) -> (i32, i32) {
    %c0_i32 = arith.constant 0 : i32
    %c0_i32_0 = arith.constant 0 : i32
    %c0_i32_1 = arith.constant 0 : i32
    return %c0_i32, %c0_i32_0 : i32, i32
  }
  func.func @transform_5(%arg0: i32) -> (i32, i32) {
    %c0_i32 = arith.constant 0 : i32
    %c0_i32_0 = arith.constant 0 : i32
    %c0_i32_1 = arith.constant 0 : i32
    return %c0_i32, %c0_i32_0 : i32, i32
  }
  func.func @transform_6(%arg0: i32) -> (i32, i32) {
    %c0_i32 = arith.constant 0 : i32
    %c0_i32_0 = arith.constant 0 : i32
    %c0_i32_1 = arith.constant 0 : i32
    return %c0_i32, %c0_i32_0 : i32, i32
  }
  func.func @transform_7(%arg0: i32) -> (i32, i32) {
    %c0_i32 = arith.constant 0 : i32
    %c0_i32_0 = arith.constant 0 : i32
    return %arg0, %c0_i32 : i32, i32
  }
}

</mosaic_0001>

<bundles_post_ra>
// kernel: dqn_forward.1
= control target key start
LH: loop header
LB: loop body
LE: loop exit
PB: predicated region body
PF: predicated region fallthrough
CT: control target
= control target key end

     0   :  { %v439_v0 = vmov 0.0   ;;  %vm440_vm0 = vmmov 0   ;;  %vm52_vm1 = vcmask 261120   ;;  %vm322_vm2 = vcmask 64512   ;;  %s574_s1 = inlined_call_operand.vmem [shape: bf16[32,128], index: 1, kind: input, shape index: {}]   ;;  %s575_s0 = inlined_call_operand.vmem [shape: f32[8,32], index: 0, kind: input, shape index: {}]   ;;  %s576_s3 = inlined_call_operand.vmem [shape: bf16[128,128], index: 3, kind: input, shape index: {}]   ;;  %s577_s5 = inlined_call_operand.vmem [shape: bf16[128,8], index: 5, kind: input, shape index: {}]   ;;  %s578_s2 = inlined_call_operand.vmem [shape: f32[1,128], index: 2, kind: input, shape index: {}]   ;;  %s579_s4 = inlined_call_operand.vmem [shape: f32[1,128], index: 4, kind: input, shape index: {}]   ;;  %s580_s6 = inlined_call_operand.vmem [shape: f32[1,8], index: 6, kind: input, shape index: {}]   ;;  %s581_s7 = inlined_call_operand.vmem [shape: f32[8,8], index: 7, kind: output, shape index: {}]  }
   0x1   :  { %371 = vmatprep.subr.bf16.mxu0 %v439_v0  ;;  %v421_v1 = vld [vmem:[%s574_s1] sm:$0xff]   ;;  %375 = vmatprep.mubr.msk.bf16.mxu0 %vm440_vm0, %v439_v0  ;;  %v422_v2 = vld [vmem:[%s574_s1 + $0x8] sm:$0xff]   ;;  %v425_v7 = vld [vmem:[%s576_s3 + $0x10] sm:$0xff]  }
   0x2   :  { %379 = vmatprep.subr.bf16.mxu1 %v439_v0  ;;  %395 = vmatprep.mubr.msk.bf16.mxu1 %vm440_vm0, %v439_v0  ;;  %v27_v3 = vld [vmem:[%s575_s0] sm:$0xff]  ;;  %v424_v6 = vld [vmem:[%s576_s3 + $0x8] sm:$0xff]   ;;  %v426_v8 = vld [vmem:[%s576_s3 + $0x18] sm:$0xff]  }
   0x3   :  { %372 = vmatpush3.bf16.msra.mxu0 %v421_v1  ;;  %v423_v4 = vld [vmem:[%s576_s3] sm:$0xff]   ;;  %v28_v5 = vpack.c.bf16 %v27_v3, %v27_v3  ;;  %v428_v10 = vld [vmem:[%s576_s3 + $0x28] sm:$0xff]   ;;  %v429_v11 = vld [vmem:[%s576_s3 + $0x30] sm:$0xff]  }
   0x4   :  { %373 = vmatprep.subr.bf16.mxu0 %v439_v0  ;;  %380 = vmatpush3.bf16.msra.mxu1 %v423_v4  ;;  %v427_v9 = vld [vmem:[%s576_s3 + $0x20] sm:$0xff]   ;;  %v430_v12 = vld [vmem:[%s576_s3 + $0x38] sm:$0xff]   ;;  %v432_v14 = vld [vmem:[%s577_s5 + $0x8] sm:$0xff]  }
   0x5   :  { %381 = vmatprep.subr.bf16.mxu1 %v439_v0  ;;  %v431_v13 = vld [vmem:[%s577_s5] sm:$0xff]   ;;  %v433_v15 = vld [vmem:[%s577_s5 + $0x10] sm:$0xff]   ;;  %v434_v16 = vld [vmem:[%s577_s5 + $0x18] sm:$0xff]  }
   0x6   :  { %v435_v17 = vld [vmem:[%s577_s5 + $0x20] sm:$0xff]   ;;  %v436_v18 = vld [vmem:[%s577_s5 + $0x28] sm:$0xff]   ;;  %v437_v27 = vld [vmem:[%s577_s5 + $0x30] sm:$0xff]  }
   0x7   :  { %374 = vmatpush3.bf16.msra.mxu0 %v422_v2  ;;  %v328_v19 = vld [vmem:[%s578_s2] ss:$0 sm:$0xff]  ;;  %v438_v28 = vld [vmem:[%s577_s5 + $0x38] sm:$0xff]  }
   0x8   :  { %399 = vmatprep.subr.bf16.mxu0 %v439_v0  ;;  %382 = vmatpush3.bf16.msra.mxu1 %v424_v6  ;;  %v332_v29 = vld [vmem:[%s579_s4] ss:$0 sm:$0xff] }
   0x9   :  { %383 = vmatprep.subr.bf16.mxu1 %v439_v0  ;;  %v341_v37 = vld [vmem:[%s580_s6] ss:$0 sm:$0xff] }
   0xa   :  { %376 = vmatmul.mubr.msk.bf16.vlgmr.msra.gmra.mrb[0].mxu0 %vm52_vm1, %v28_v5 }
   0xb   :  { %415 = vmatprep.mubr.msk.bf16.mxu0 %vm440_vm0, %v439_v0  ;;  %400 = vmatpush3.bf16.msra.mxu0 %v431_v13 }
   0xc   :  { %384 = vmatpush3.bf16.msra.mxu1 %v425_v7  ;;  %401 = vmatprep.subr.bf16.mxu0 %v439_v0 }
   0xd   :  { %385 = vmatprep.subr.bf16.mxu1 %v439_v0 }
   0xf   :  { %402 = vmatpush3.bf16.msra.mxu0 %v432_v14 }
  0x10   :  { %386 = vmatpush3.bf16.msra.mxu1 %v426_v8  ;;  %403 = vmatprep.subr.bf16.mxu0 %v439_v0 }
  0x11   :  { %387 = vmatprep.subr.bf16.mxu1 %v439_v0 }
  0x13   :  { %404 = vmatpush3.bf16.msra.mxu0 %v433_v15 }
  0x14   :  { %388 = vmatpush3.bf16.msra.mxu1 %v427_v9  ;;  %405 = vmatprep.subr.bf16.mxu0 %v439_v0 }
  0x15   :  { %389 = vmatprep.subr.bf16.mxu1 %v439_v0 }
  0x17   :  { %406 = vmatpush3.bf16.msra.mxu0 %v434_v16 }
  0x18   :  { %390 = vmatpush3.bf16.msra.mxu1 %v428_v10  ;;  %407 = vmatprep.subr.bf16.mxu0 %v439_v0 }
  0x19   :  { %391 = vmatprep.subr.bf16.mxu1 %v439_v0 }
  0x1b   :  { %408 = vmatpush3.bf16.msra.mxu0 %v435_v17 }
  0x1c   :  { %392 = vmatpush3.bf16.msra.mxu1 %v429_v11  ;;  %409 = vmatprep.subr.bf16.mxu0 %v439_v0 }
  0x1d   :  { %393 = vmatprep.subr.bf16.mxu1 %v439_v0 }
  0x1f   :  { %410 = vmatpush3.bf16.msra.mxu0 %v436_v18 }
  0x20   :  { %394 = vmatpush3.bf16.msra.mxu1 %v430_v12  ;;  %411 = vmatprep.subr.bf16.mxu0 %v439_v0 }
  0x23   :  { %412 = vmatpush3.bf16.msra.mxu0 %v437_v27 }
  0x24   :  { %413 = vmatprep.subr.bf16.mxu0 %v439_v0 }
  0x27   :  { %414 = vmatpush3.bf16.msra.mxu0 %v438_v28 }
  0xdd   :  { %v90_v20 = vpop.f32.mrb[0].mxu0 }
  0xde   :  { %v91_v21 = vadd.f32 %v328_v19, %v90_v20  ;;  %v377_v22 = vpop.f32.mrb[1].mxu0 }
  0xdf   :  { %v93_v23 = vpop.f32.mrb[2].mxu0 }
  0xe0   :  { %v96_v24 = vmax.f32 %v91_v21, 0.0  ;;  %v378_v25 = vpop.f32.mrb[3].mxu0 }
  0xe2   :  { %v97_v26 = vpack.c.bf16 %v96_v24, %v96_v24 }
  0xe4   :  { %396 = vmatmul.mubr.bf16.vlgmr.msra.gmra.mrb[0].mxu1 %v97_v26 }
 0x1b7   :  { %v203_v30 = vpop.f32.mrb[0].mxu1 }
 0x1b8   :  { %v204_v31 = vadd.f32 %v332_v29, %v203_v30  ;;  %v397_v32 = vpop.f32.mrb[1].mxu1 }
 0x1b9   :  { %v206_v33 = vpop.f32.mrb[2].mxu1 }
 0x1ba   :  { %v209_v34 = vmax.f32 %v204_v31, 0.0  ;;  %v398_v35 = vpop.f32.mrb[3].mxu1 }
 0x1bc   :  { %v210_v36 = vpack.c.bf16 %v209_v34, %v209_v34 }
 0x1be   :  { %416 = vmatmul.mubr.bf16.vlgmr.msra.gmra.mrb[4].mxu0 %v210_v36 }
 0x291   :  { %v316_v38 = vpop.f32.mrb[4].mxu0 }
 0x292   :  { %v317_v39 = vadd.f32 %v341_v37, %v316_v38  ;;  %v417_v40 = vpop.f32.mrb[5].mxu0 }
 0x293   :  { %v319_v41 = vpop.f32.mrb[6].mxu0 }
 0x294   :  { %323 = vst.msk [vmem:[%s581_s7] sm:$0xff] %vm322_vm2, %v317_v39  ;;  %v418_v42 = vpop.f32.mrb[7].mxu0 }

</bundles_post_ra>
